<compile_context>
chip_gen: v5e
topology: v5e:2x2
jax: 0.10.0
libtpu: 0.0.40
codegen_flags: <defaults>
</compile_context>

<pallas_src>
import jax
import jax.numpy as jnp
from jax.experimental import pallas as pl
from jax.experimental.pallas import tpu as pltpu


def _round_up(x, m):
    return ((x + m - 1) // m) * m


# ----------------------------------------------------------------------------
# Fused whole-network kernel (activations are (features, TB), batch on lanes)
# ----------------------------------------------------------------------------
def _make_fused_kernel(use_ln_per_layer, degree, eps, out_dims):
    """Kernel ref order:
       scal_ref (SMEM 1D, recurrence scalars), x_ref (I0, TB),
       per layer: [w_ref (O, degree*I)], bias_ref (O, 1), [gamma (O,1), beta (O,1)],
       o_ref (out_dim, TB).
    """
    n_scal = max(1, 2 * degree - 1)          # scalars stored per layer

    def kernel(scal_ref, x_ref, *rest):
        o_ref = rest[-1]
        refs = rest[:-1]
        ridx = 0
        h = x_ref[...].astype(jnp.float32)   # (I0, TB)

        for li, use_ln in enumerate(use_ln_per_layer):
            if degree >= 1:
                w_ref = refs[ridx]; ridx += 1        # (O, degree*I)
            b_ref = refs[ridx]; ridx += 1            # (O, 1)  (T0 folded in)
            if use_ln:
                g_ref = refs[ridx]; ridx += 1        # (O, 1)
                bt_ref = refs[ridx]; ridx += 1       # (O, 1)

            s = jax.nn.sigmoid(h)                    # torch.sigmoid(x), (I, TB)

            if degree >= 1:
                base = li * n_scal
                # Gottlieb recurrence T1..Td (T0 == 1 folded into bias).
                # Scalars come precomputed from SMEM; only scalar*vector ops.
                t_list = []
                t_cur = scal_ref[base] * s           # T1 = 2*alpha*s
                t_list.append(t_cur)
                t_prev = None
                t_prev_is_ones = True
                for n in range(2, degree + 1):
                    c1 = scal_ref[base + 1 + 2 * (n - 2)]   # 2*(alpha+n-1)
                    c2 = scal_ref[base + 2 + 2 * (n - 2)]   # alpha+2n-2
                    if t_prev_is_ones:
                        t_next = c1 * s * t_cur - c2        # T0 == ones
                        t_prev_is_ones = False
                    else:
                        t_next = c1 * s * t_cur - c2 * t_prev
                    t_list.append(t_next)
                    t_prev, t_cur = t_cur, t_next

                # Sublane (axis-0) stack: cheap vs. the old lane-axis concat.
                t_stack = (jnp.concatenate(t_list, axis=0)
                           if len(t_list) > 1 else t_list[0])   # (degree*I, TB)
                # Single MXU matmul per layer, dense N = TB, f32 accumulation.
                y = jnp.dot(w_ref[...], t_stack,
                            preferred_element_type=jnp.float32)  # (O, TB)
                y = y + b_ref[...]
            else:
                # degree == 0: output is just the T0 bias column.
                y = jnp.broadcast_to(b_ref[...], (out_dims[li], h.shape[-1]))

            if use_ln:
                # LayerNorm over features (rows); fused single-pass stats.
                inv_o = 1.0 / float(out_dims[li])
                mean = jnp.sum(y, axis=0, keepdims=True) * inv_o        # (1, TB)
                ex2 = jnp.sum(y * y, axis=0, keepdims=True) * inv_o     # (1, TB)
                var = ex2 - mean * mean
                y = (y - mean) * jax.lax.rsqrt(var + eps)
                y = y * g_ref[...] + bt_ref[...]

            h = y

        o_ref[...] = h.astype(o_ref.dtype)

    return kernel


# ----------------------------------------------------------------------------
# Parameter construction mirroring GottliebKAN.__init__ (kernel layout baked in)
# ----------------------------------------------------------------------------
def build_gottlieb_kan_params(key, layers_hidden, spline_order=3, eps=1e-5):
    degree = spline_order
    expanded = ([layers_hidden[0]]
                + sum([[h] * 2 for h in layers_hidden[1:-1]], [])
                + [layers_hidden[-1]])
    cfgs = [(i, o, True) for (i, o) in zip(expanded, expanded[1:-1])]
    cfgs.append((expanded[-2], expanded[-1], False))         # final, no LN

    n_scal = max(1, 2 * degree - 1)
    scalars = []              # flat 1D -> SMEM
    kernel_weights = []       # per layer: [w_t?, bias_t, (gamma, beta)]
    use_ln_list, out_dims = [], []
    raw_layers = []           # original-layout params for the JAX reference

    for (in_dim, out_dim, use_ln) in cfgs:
        key, k_alpha, k_coef = jax.random.split(key, 3)
        alpha = jax.random.normal(k_alpha, (), dtype=jnp.float32)
        std = 1.0 / (in_dim * (degree + 1))
        coeffs = std * jax.random.normal(
            k_coef, (in_dim, out_dim, degree + 1), dtype=jnp.float32)

        # Precomputed recurrence scalars: [2a, 2(a+1), a+2, 2(a+2), a+4, ...]
        sc = []
        if degree >= 1:
            sc.append(2.0 * alpha)
            for n in range(2, degree + 1):
                sc.append(2.0 * (alpha + (n - 1)))
                sc.append(alpha + (2 * n - 2))
        while len(sc) < n_scal:                       # degree==0 dummy slot
            sc.append(jnp.zeros((), jnp.float32))
        scalars.extend(sc)

        # Transposed kernel layout, built ONCE here:
        #   bias_t[o, 0]          = sum_i coeffs[i, o, 0]     (T0 == 1 folded in)
        #   w_t[o, (n-1)*I + i]   = coeffs[i, o, n]           -> (O, degree*I)
        bias_t = jnp.sum(coeffs[:, :, 0], axis=0).reshape(out_dim, 1)
        ops = []
        if degree >= 1:
            w_t = jnp.concatenate(
                [coeffs[:, :, n].T for n in range(1, degree + 1)], axis=1)
            ops.append(w_t)
        ops.append(bias_t)
        if use_ln:
            ops.append(jnp.ones((out_dim, 1), jnp.float32))    # gamma (LN default)
            ops.append(jnp.zeros((out_dim, 1), jnp.float32))   # beta
        kernel_weights.append(ops)
        use_ln_list.append(use_ln)
        out_dims.append(out_dim)
        raw_layers.append(dict(alpha=alpha, coeffs=coeffs, use_ln=use_ln))

    return dict(
        scalars=jnp.stack(scalars).astype(jnp.float32),
        weights=kernel_weights,
        use_ln=tuple(use_ln_list),
        out_dims=tuple(out_dims),
        degree=degree,
        eps=eps,
        in_dim=layers_hidden[0],
        out_dim=cfgs[-1][1],
        raw_layers=raw_layers,
    )


# ----------------------------------------------------------------------------
# Forward: one pallas_call for the whole network, batch-tiled (lane axis) grid
# ----------------------------------------------------------------------------
def gottlieb_kan_forward(x, model, *, tb_max=2048, min_grid_steps=1):
    in_dim = model["in_dim"]
    out_dim = model["out_dim"]
    x2 = x.reshape(-1, in_dim).astype(jnp.float32)
    B = x2.shape[0]

    # Batch lives on the LANE axis -> tile must be a multiple of 128.
    B128 = _round_up(B, 128)
    TB = min(B128, tb_max)
    # v7x (2 TensorCores): pass min_grid_steps=2 so the "parallel" batch axis
    # has >=2 steps to split across cores when the batch is large enough.
    if min_grid_steps > 1:
        TB = min(TB, max(128, _round_up(-(-B128 // min_grid_steps), 128)))
    B_pad = _round_up(B, TB)

    # Layout plumbing done once in the wrapper: (B, I) -> (I, B_pad).
    x_t = x2.T
    if B_pad != B:
        x_t = jnp.pad(x_t, ((0, 0), (0, B_pad - B)))

    kernel = _make_fused_kernel(model["use_ln"], model["degree"],
                                model["eps"], model["out_dims"])
    flat_weights = [w for ops in model["weights"] for w in ops]

    in_specs = [
        pl.BlockSpec(memory_space=pltpu.MemorySpace.SMEM),    # recurrence scalars
        pl.BlockSpec((in_dim, TB), lambda i: (0, i)),         # x tile (I0, TB)
    ]
    for w in flat_weights:                                    # resident weights
        in_specs.append(pl.BlockSpec(w.shape, lambda i: (0, 0)))

    out_t = pl.pallas_call(
        kernel,
        out_shape=jax.ShapeDtypeStruct((out_dim, B_pad), jnp.float32),
        grid=(B_pad // TB,),
        in_specs=in_specs,
        out_specs=pl.BlockSpec((out_dim, TB), lambda i: (0, i)),
        compiler_params=pltpu.CompilerParams(
            dimension_semantics=("parallel",),
            # Above the v5e 16 MiB scoped default; with TB<=2048 the
            # double-buffered x/out tiles + intermediates stay a few MiB,
            # comfortably under the v7x 64 MiB physical ceiling.
            vmem_limit_bytes=32 * 1024 * 1024,
        ),
    )(model["scalars"], x_t, *flat_weights)

    return out_t[:, :B].T                                     # (B, out_dim)


# ----------------------------------------------------------------------------
# Pure-JAX reference (mirrors the PyTorch module exactly)
# ----------------------------------------------------------------------------
def _gottlieb_basis_ref(x, alpha, degree):
    ts = [jnp.ones_like(x)]
    if degree >= 1:
        ts.append(2.0 * alpha * x)
    for n in range(2, degree + 1):
        ts.append(2.0 * (alpha + n - 1) * x * ts[-1]
                  - (alpha + 2 * n - 2) * ts[-2])
    return jnp.stack(ts, axis=-1)


def gottlieb_kan_reference(x, model):
    x2 = x.reshape(-1, model["in_dim"]).astype(jnp.float32)
    for layer in model["raw_layers"]:
        s = jax.nn.sigmoid(x2)
        basis = _gottlieb_basis_ref(s, layer["alpha"], model["degree"])
        y = jnp.einsum('bid,iod->bo', basis, layer["coeffs"])
        if layer["use_ln"]:
            mean = jnp.mean(y, axis=-1, keepdims=True)
            var = jnp.mean(jnp.square(y - mean), axis=-1, keepdims=True)
            y = (y - mean) * jax.lax.rsqrt(var + model["eps"])
            # gamma == 1, beta == 0 at init -> affine is identity
        x2 = y
    return x2


# ----------------------------------------------------------------------------
if __name__ == "__main__":
    layers_hidden = [16, 32, 8]   # layers: 16->32 (LN), 32->32 (LN), 32->8
    spline_order = 3

    key = jax.random.PRNGKey(0)
    k_x, k_params = jax.random.split(key)

    # Input (2, 4, 16) is flattened inside forward to (8, 16), like the
    # PyTorch module's x.view(-1, layers_hidden[0]).
    x = jax.random.normal(k_x, (2, 4, 16), dtype=jnp.float32)

    model = build_gottlieb_kan_params(k_params, layers_hidden, spline_order)

    out = gottlieb_kan_forward(x, model)
    out = jax.block_until_ready(out)

    ref = gottlieb_kan_reference(x, model)
    assert out.shape == (8, layers_hidden[-1]), out.shape
    max_err = float(jnp.max(jnp.abs(out - ref)))
    # Tolerance covers the fused one-pass LN variance and matmul reordering.
    assert max_err < 1e-4, f"max abs err = {max_err}"

    print("KERNEL_OK")
</pallas_src>

<mosaic_0001>
module attributes {stable_mosaic.version = 11 : i64} {
  func.func @kernel(%arg0: i32, %arg1: memref<15xf32, #tpu.memory_space<smem>>, %arg2: memref<16x128xf32, #tpu.memory_space<vmem>>, %arg3: memref<32x48xf32, #tpu.memory_space<vmem>>, %arg4: memref<32x1xf32, #tpu.memory_space<vmem>>, %arg5: memref<32x1xf32, #tpu.memory_space<vmem>>, %arg6: memref<32x1xf32, #tpu.memory_space<vmem>>, %arg7: memref<32x96xf32, #tpu.memory_space<vmem>>, %arg8: memref<32x1xf32, #tpu.memory_space<vmem>>, %arg9: memref<32x1xf32, #tpu.memory_space<vmem>>, %arg10: memref<32x1xf32, #tpu.memory_space<vmem>>, %arg11: memref<8x96xf32, #tpu.memory_space<vmem>>, %arg12: memref<8x1xf32, #tpu.memory_space<vmem>>, %arg13: memref<8x128xf32, #tpu.memory_space<vmem>>) attributes {dimension_semantics = [#tpu.dimension_semantics<parallel>], iteration_bounds = array<i64: 1>, scalar_prefetch = 0 : i64, scratch_operands = 0 : i64, tpu.core_type = #tpu.core_type<tc>, window_params = [{transform_indices = @transform_0, window_bounds = array<i64: 15>}, {transform_indices = @transform_1, window_bounds = array<i64: 16, 128>}, {pipeline_mode = #tpu.pipeline_mode<synchronous>, transform_indices = @transform_2, window_bounds = array<i64: 32, 48>}, {pipeline_mode = #tpu.pipeline_mode<synchronous>, transform_indices = @transform_3, window_bounds = array<i64: 32, 1>}, {pipeline_mode = #tpu.pipeline_mode<synchronous>, transform_indices = @transform_4, window_bounds = array<i64: 32, 1>}, {pipeline_mode = #tpu.pipeline_mode<synchronous>, transform_indices = @transform_5, window_bounds = array<i64: 32, 1>}, {pipeline_mode = #tpu.pipeline_mode<synchronous>, transform_indices = @transform_6, window_bounds = array<i64: 32, 96>}, {pipeline_mode = #tpu.pipeline_mode<synchronous>, transform_indices = @transform_7, window_bounds = array<i64: 32, 1>}, {pipeline_mode = #tpu.pipeline_mode<synchronous>, transform_indices = @transform_8, window_bounds = array<i64: 32, 1>}, {pipeline_mode = #tpu.pipeline_mode<synchronous>, transform_indices = @transform_9, window_bounds = array<i64: 32, 1>}, {pipeline_mode = #tpu.pipeline_mode<synchronous>, transform_indices = @transform_10, window_bounds = array<i64: 8, 96>}, {pipeline_mode = #tpu.pipeline_mode<synchronous>, transform_indices = @transform_11, window_bounds = array<i64: 8, 1>}, {transform_indices = @transform_12, window_bounds = array<i64: 8, 128>}]} {
    %c0 = arith.constant 0 : index
    %c0_0 = arith.constant 0 : index
    %0 = vector.load %arg2[%c0, %c0_0] : memref<16x128xf32, #tpu.memory_space<vmem>>, vector<16x128xf32>
    %1 = arith.negf %0 : vector<16x128xf32>
    %2 = math.exp %1 : vector<16x128xf32>
    %cst = arith.constant 1.000000e+00 : f32
    %3 = vector.broadcast %cst : f32 to vector<16x128xf32>
    %4 = arith.addf %3, %2 : vector<16x128xf32>
    %5 = arith.divf %3, %4 : vector<16x128xf32>
    %c0_1 = arith.constant 0 : index
    %6 = memref.load %arg1[%c0_1] : memref<15xf32, #tpu.memory_space<smem>>
    %7 = vector.broadcast %6 : f32 to vector<16x128xf32>
    %8 = arith.mulf %7, %5 : vector<16x128xf32>
    %c1 = arith.constant 1 : index
    %9 = memref.load %arg1[%c1] : memref<15xf32, #tpu.memory_space<smem>>
    %c2 = arith.constant 2 : index
    %10 = memref.load %arg1[%c2] : memref<15xf32, #tpu.memory_space<smem>>
    %11 = vector.broadcast %9 : f32 to vector<16x128xf32>
    %12 = arith.mulf %11, %5 : vector<16x128xf32>
    %13 = arith.mulf %12, %8 : vector<16x128xf32>
    %14 = vector.broadcast %10 : f32 to vector<16x128xf32>
    %15 = arith.subf %13, %14 : vector<16x128xf32>
    %c3 = arith.constant 3 : index
    %16 = memref.load %arg1[%c3] : memref<15xf32, #tpu.memory_space<smem>>
    %c4 = arith.constant 4 : index
    %17 = memref.load %arg1[%c4] : memref<15xf32, #tpu.memory_space<smem>>
    %18 = vector.broadcast %16 : f32 to vector<16x128xf32>
    %19 = arith.mulf %18, %5 : vector<16x128xf32>
    %20 = arith.mulf %19, %15 : vector<16x128xf32>
    %21 = vector.broadcast %17 : f32 to vector<16x128xf32>
    %22 = arith.mulf %21, %8 : vector<16x128xf32>
    %23 = arith.subf %20, %22 : vector<16x128xf32>
    %24 = tpu.concatenate %8, %15, %23 in 0 : vector<16x128xf32>, vector<16x128xf32>, vector<16x128xf32> -> vector<48x128xf32>
    %c0_2 = arith.constant 0 : index
    %c0_3 = arith.constant 0 : index
    %25 = vector.load %arg3[%c0_2, %c0_3] : memref<32x48xf32, #tpu.memory_space<vmem>>, vector<32x48xf32>
    %cst_4 = arith.constant dense<0.000000e+00> : vector<32x128xf32>
    %26 = tpu.matmul %25, %24, %cst_4 {dimension_numbers = #tpu.dot_dimension_numbers<[1], [0], [0], [1], [0, 0, 1, 1], [], []>} : vector<32x48xf32>, vector<48x128xf32>, vector<32x128xf32> -> vector<32x128xf32>
    %c0_5 = arith.constant 0 : index
    %c0_6 = arith.constant 0 : index
    %27 = vector.load %arg4[%c0_5, %c0_6] : memref<32x1xf32, #tpu.memory_space<vmem>>, vector<32x1xf32>
    %28 = vector.broadcast %27 : vector<32x1xf32> to vector<32x128xf32>
    %29 = arith.addf %26, %28 : vector<32x128xf32>
    %cst_7 = arith.constant dense<0.000000e+00> : vector<128xf32>
    %30 = vector.multi_reduction <add>, %29, %cst_7 [0] : vector<32x128xf32> to vector<128xf32>
    %31 = vector.shape_cast %30 : vector<128xf32> to vector<1x128xf32>
    %cst_8 = arith.constant 3.125000e-02 : f32
    %32 = vector.broadcast %cst_8 : f32 to vector<1x128xf32>
    %33 = arith.mulf %31, %32 : vector<1x128xf32>
    %34 = arith.mulf %29, %29 : vector<32x128xf32>
    %cst_9 = arith.constant dense<0.000000e+00> : vector<128xf32>
    %35 = vector.multi_reduction <add>, %34, %cst_9 [0] : vector<32x128xf32> to vector<128xf32>
    %36 = vector.shape_cast %35 : vector<128xf32> to vector<1x128xf32>
    %cst_10 = arith.constant 3.125000e-02 : f32
    %37 = vector.broadcast %cst_10 : f32 to vector<1x128xf32>
    %38 = arith.mulf %36, %37 : vector<1x128xf32>
    %39 = arith.mulf %33, %33 : vector<1x128xf32>
    %40 = arith.subf %38, %39 : vector<1x128xf32>
    %41 = vector.broadcast %33 : vector<1x128xf32> to vector<32x128xf32>
    %42 = arith.subf %29, %41 : vector<32x128xf32>
    %cst_11 = arith.constant 9.99999974E-6 : f32
    %43 = vector.broadcast %cst_11 : f32 to vector<1x128xf32>
    %44 = arith.addf %40, %43 : vector<1x128xf32>
    %45 = math.rsqrt %44 : vector<1x128xf32>
    %46 = vector.broadcast %45 : vector<1x128xf32> to vector<32x128xf32>
    %47 = arith.mulf %42, %46 : vector<32x128xf32>
    %c0_12 = arith.constant 0 : index
    %c0_13 = arith.constant 0 : index
    %48 = vector.load %arg5[%c0_12, %c0_13] : memref<32x1xf32, #tpu.memory_space<vmem>>, vector<32x1xf32>
    %49 = vector.broadcast %48 : vector<32x1xf32> to vector<32x128xf32>
    %50 = arith.mulf %47, %49 : vector<32x128xf32>
    %c0_14 = arith.constant 0 : index
    %c0_15 = arith.constant 0 : index
    %51 = vector.load %arg6[%c0_14, %c0_15] : memref<32x1xf32, #tpu.memory_space<vmem>>, vector<32x1xf32>
    %52 = vector.broadcast %51 : vector<32x1xf32> to vector<32x128xf32>
    %53 = arith.addf %50, %52 : vector<32x128xf32>
    %54 = arith.negf %53 : vector<32x128xf32>
    %55 = math.exp %54 : vector<32x128xf32>
    %cst_16 = arith.constant 1.000000e+00 : f32
    %56 = vector.broadcast %cst_16 : f32 to vector<32x128xf32>
    %57 = arith.addf %56, %55 : vector<32x128xf32>
    %58 = arith.divf %56, %57 : vector<32x128xf32>
    %c5 = arith.constant 5 : index
    %59 = memref.load %arg1[%c5] : memref<15xf32, #tpu.memory_space<smem>>
    %60 = vector.broadcast %59 : f32 to vector<32x128xf32>
    %61 = arith.mulf %60, %58 : vector<32x128xf32>
    %c6 = arith.constant 6 : index
    %62 = memref.load %arg1[%c6] : memref<15xf32, #tpu.memory_space<smem>>
    %c7 = arith.constant 7 : index
    %63 = memref.load %arg1[%c7] : memref<15xf32, #tpu.memory_space<smem>>
    %64 = vector.broadcast %62 : f32 to vector<32x128xf32>
    %65 = arith.mulf %64, %58 : vector<32x128xf32>
    %66 = arith.mulf %65, %61 : vector<32x128xf32>
    %67 = vector.broadcast %63 : f32 to vector<32x128xf32>
    %68 = arith.subf %66, %67 : vector<32x128xf32>
    %c8 = arith.constant 8 : index
    %69 = memref.load %arg1[%c8] : memref<15xf32, #tpu.memory_space<smem>>
    %c9 = arith.constant 9 : index
    %70 = memref.load %arg1[%c9] : memref<15xf32, #tpu.memory_space<smem>>
    %71 = vector.broadcast %69 : f32 to vector<32x128xf32>
    %72 = arith.mulf %71, %58 : vector<32x128xf32>
    %73 = arith.mulf %72, %68 : vector<32x128xf32>
    %74 = vector.broadcast %70 : f32 to vector<32x128xf32>
    %75 = arith.mulf %74, %61 : vector<32x128xf32>
    %76 = arith.subf %73, %75 : vector<32x128xf32>
    %77 = tpu.concatenate %61, %68, %76 in 0 : vector<32x128xf32>, vector<32x128xf32>, vector<32x128xf32> -> vector<96x128xf32>
    %c0_17 = arith.constant 0 : index
    %c0_18 = arith.constant 0 : index
    %78 = vector.load %arg7[%c0_17, %c0_18] : memref<32x96xf32, #tpu.memory_space<vmem>>, vector<32x96xf32>
    %cst_19 = arith.constant dense<0.000000e+00> : vector<32x128xf32>
    %79 = tpu.matmul %78, %77, %cst_19 {dimension_numbers = #tpu.dot_dimension_numbers<[1], [0], [0], [1], [0, 0, 1, 1], [], []>} : vector<32x96xf32>, vector<96x128xf32>, vector<32x128xf32> -> vector<32x128xf32>
    %c0_20 = arith.constant 0 : index
    %c0_21 = arith.constant 0 : index
    %80 = vector.load %arg8[%c0_20, %c0_21] : memref<32x1xf32, #tpu.memory_space<vmem>>, vector<32x1xf32>
    %81 = vector.broadcast %80 : vector<32x1xf32> to vector<32x128xf32>
    %82 = arith.addf %79, %81 : vector<32x128xf32>
    %cst_22 = arith.constant dense<0.000000e+00> : vector<128xf32>
    %83 = vector.multi_reduction <add>, %82, %cst_22 [0] : vector<32x128xf32> to vector<128xf32>
    %84 = vector.shape_cast %83 : vector<128xf32> to vector<1x128xf32>
    %cst_23 = arith.constant 3.125000e-02 : f32
    %85 = vector.broadcast %cst_23 : f32 to vector<1x128xf32>
    %86 = arith.mulf %84, %85 : vector<1x128xf32>
    %87 = arith.mulf %82, %82 : vector<32x128xf32>
    %cst_24 = arith.constant dense<0.000000e+00> : vector<128xf32>
    %88 = vector.multi_reduction <add>, %87, %cst_24 [0] : vector<32x128xf32> to vector<128xf32>
    %89 = vector.shape_cast %88 : vector<128xf32> to vector<1x128xf32>
    %cst_25 = arith.constant 3.125000e-02 : f32
    %90 = vector.broadcast %cst_25 : f32 to vector<1x128xf32>
    %91 = arith.mulf %89, %90 : vector<1x128xf32>
    %92 = arith.mulf %86, %86 : vector<1x128xf32>
    %93 = arith.subf %91, %92 : vector<1x128xf32>
    %94 = vector.broadcast %86 : vector<1x128xf32> to vector<32x128xf32>
    %95 = arith.subf %82, %94 : vector<32x128xf32>
    %cst_26 = arith.constant 9.99999974E-6 : f32
    %96 = vector.broadcast %cst_26 : f32 to vector<1x128xf32>
    %97 = arith.addf %93, %96 : vector<1x128xf32>
    %98 = math.rsqrt %97 : vector<1x128xf32>
    %99 = vector.broadcast %98 : vector<1x128xf32> to vector<32x128xf32>
    %100 = arith.mulf %95, %99 : vector<32x128xf32>
    %c0_27 = arith.constant 0 : index
    %c0_28 = arith.constant 0 : index
    %101 = vector.load %arg9[%c0_27, %c0_28] : memref<32x1xf32, #tpu.memory_space<vmem>>, vector<32x1xf32>
    %102 = vector.broadcast %101 : vector<32x1xf32> to vector<32x128xf32>
    %103 = arith.mulf %100, %102 : vector<32x128xf32>
    %c0_29 = arith.constant 0 : index
    %c0_30 = arith.constant 0 : index
    %104 = vector.load %arg10[%c0_29, %c0_30] : memref<32x1xf32, #tpu.memory_space<vmem>>, vector<32x1xf32>
    %105 = vector.broadcast %104 : vector<32x1xf32> to vector<32x128xf32>
    %106 = arith.addf %103, %105 : vector<32x128xf32>
    %107 = arith.negf %106 : vector<32x128xf32>
    %108 = math.exp %107 : vector<32x128xf32>
    %cst_31 = arith.constant 1.000000e+00 : f32
    %109 = vector.broadcast %cst_31 : f32 to vector<32x128xf32>
    %110 = arith.addf %109, %108 : vector<32x128xf32>
    %111 = arith.divf %109, %110 : vector<32x128xf32>
    %c10 = arith.constant 10 : index
    %112 = memref.load %arg1[%c10] : memref<15xf32, #tpu.memory_space<smem>>
    %113 = vector.broadcast %112 : f32 to vector<32x128xf32>
    %114 = arith.mulf %113, %111 : vector<32x128xf32>
    %c11 = arith.constant 11 : index
    %115 = memref.load %arg1[%c11] : memref<15xf32, #tpu.memory_space<smem>>
    %c12 = arith.constant 12 : index
    %116 = memref.load %arg1[%c12] : memref<15xf32, #tpu.memory_space<smem>>
    %117 = vector.broadcast %115 : f32 to vector<32x128xf32>
    %118 = arith.mulf %117, %111 : vector<32x128xf32>
    %119 = arith.mulf %118, %114 : vector<32x128xf32>
    %120 = vector.broadcast %116 : f32 to vector<32x128xf32>
    %121 = arith.subf %119, %120 : vector<32x128xf32>
    %c13 = arith.constant 13 : index
    %122 = memref.load %arg1[%c13] : memref<15xf32, #tpu.memory_space<smem>>
    %c14 = arith.constant 14 : index
    %123 = memref.load %arg1[%c14] : memref<15xf32, #tpu.memory_space<smem>>
    %124 = vector.broadcast %122 : f32 to vector<32x128xf32>
    %125 = arith.mulf %124, %111 : vector<32x128xf32>
    %126 = arith.mulf %125, %121 : vector<32x128xf32>
    %127 = vector.broadcast %123 : f32 to vector<32x128xf32>
    %128 = arith.mulf %127, %114 : vector<32x128xf32>
    %129 = arith.subf %126, %128 : vector<32x128xf32>
    %130 = tpu.concatenate %114, %121, %129 in 0 : vector<32x128xf32>, vector<32x128xf32>, vector<32x128xf32> -> vector<96x128xf32>
    %c0_32 = arith.constant 0 : index
    %c0_33 = arith.constant 0 : index
    %131 = vector.load %arg11[%c0_32, %c0_33] : memref<8x96xf32, #tpu.memory_space<vmem>>, vector<8x96xf32>
    %cst_34 = arith.constant dense<0.000000e+00> : vector<8x128xf32>
    %132 = tpu.matmul %131, %130, %cst_34 {dimension_numbers = #tpu.dot_dimension_numbers<[1], [0], [0], [1], [0, 0, 1, 1], [], []>} : vector<8x96xf32>, vector<96x128xf32>, vector<8x128xf32> -> vector<8x128xf32>
    %c0_35 = arith.constant 0 : index
    %c0_36 = arith.constant 0 : index
    %133 = vector.load %arg12[%c0_35, %c0_36] : memref<8x1xf32, #tpu.memory_space<vmem>>, vector<8x1xf32>
    %134 = vector.broadcast %133 : vector<8x1xf32> to vector<8x128xf32>
    %135 = arith.addf %132, %134 : vector<8x128xf32>
    %c0_37 = arith.constant 0 : index
    %c0_38 = arith.constant 0 : index
    %136 = vector.load %arg13[%c0_37, %c0_38] : memref<8x128xf32, #tpu.memory_space<vmem>>, vector<8x128xf32>
    tpu.vector_store %arg13[%c0_37, %c0_38], %135 {strides = array<i32>} : memref<8x128xf32, #tpu.memory_space<vmem>>, vector<8x128xf32>,
    return
  }
  func.func @transform_0(%arg0: i32) -> i32 {
    %c0_i32 = arith.constant 0 : i32
    %c0_i32_0 = arith.constant 0 : i32
    return %c0_i32 : i32
  }
  func.func @transform_1(%arg0: i32) -> (i32, i32) {
    %c0_i32 = arith.constant 0 : i32
    %c0_i32_0 = arith.constant 0 : i32
    return %c0_i32, %arg0 : i32, i32
  }
  func.func @transform_2(%arg0: i32) -> (i32, i32) {
    %c0_i32 = arith.constant 0 : i32
    %c0_i32_0 = arith.constant 0 : i32
    %c0_i32_1 = arith.constant 0 : i32
    return %c0_i32, %c0_i32_0 : i32, i32
  }
  func.func @transform_3(%arg0: i32) -> (i32, i32) {
    %c0_i32 = arith.constant 0 : i32
    %c0_i32_0 = arith.constant 0 : i32
    %c0_i32_1 = arith.constant 0 : i32
    return %c0_i32, %c0_i32_0 : i32, i32
  }
  func.func @transform_4(%arg0: i32) -> (i32, i32) {
    %c0_i32 = arith.constant 0 : i32
    %c0_i32_0 = arith.constant 0 : i32
    %c0_i32_1 = arith.constant 0 : i32
    return %c0_i32, %c0_i32_0 : i32, i32
  }
  func.func @transform_5(%arg0: i32) -> (i32, i32) {
    %c0_i32 = arith.constant 0 : i32
    %c0_i32_0 = arith.constant 0 : i32
    %c0_i32_1 = arith.constant 0 : i32
    return %c0_i32, %c0_i32_0 : i32, i32
  }
  func.func @transform_6(%arg0: i32) -> (i32, i32) {
    %c0_i32 = arith.constant 0 : i32
    %c0_i32_0 = arith.constant 0 : i32
    %c0_i32_1 = arith.constant 0 : i32
    return %c0_i32, %c0_i32_0 : i32, i32
  }
  func.func @transform_7(%arg0: i32) -> (i32, i32) {
    %c0_i32 = arith.constant 0 : i32
    %c0_i32_0 = arith.constant 0 : i32
    %c0_i32_1 = arith.constant 0 : i32
    return %c0_i32, %c0_i32_0 : i32, i32
  }
  func.func @transform_8(%arg0: i32) -> (i32, i32) {
    %c0_i32 = arith.constant 0 : i32
    %c0_i32_0 = arith.constant 0 : i32
    %c0_i32_1 = arith.constant 0 : i32
    return %c0_i32, %c0_i32_0 : i32, i32
  }
  func.func @transform_9(%arg0: i32) -> (i32, i32) {
    %c0_i32 = arith.constant 0 : i32
    %c0_i32_0 = arith.constant 0 : i32
    %c0_i32_1 = arith.constant 0 : i32
    return %c0_i32, %c0_i32_0 : i32, i32
  }
  func.func @transform_10(%arg0: i32) -> (i32, i32) {
    %c0_i32 = arith.constant 0 : i32
    %c0_i32_0 = arith.constant 0 : i32
    %c0_i32_1 = arith.constant 0 : i32
    return %c0_i32, %c0_i32_0 : i32, i32
  }
  func.func @transform_11(%arg0: i32) -> (i32, i32) {
    %c0_i32 = arith.constant 0 : i32
    %c0_i32_0 = arith.constant 0 : i32
    %c0_i32_1 = arith.constant 0 : i32
    return %c0_i32, %c0_i32_0 : i32, i32
  }
  func.func @transform_12(%arg0: i32) -> (i32, i32) {
    %c0_i32 = arith.constant 0 : i32
    %c0_i32_0 = arith.constant 0 : i32
    return %c0_i32, %arg0 : i32, i32
  }
}

</mosaic_0001>

<bundles_post_ra>
// kernel: tpu_custom_call.1
= control target key start
LH: loop header
LB: loop body
LE: loop exit
PB: predicated region body
PF: predicated region fallthrough
CT: control target
= control target key end

     0   :  { %17 = vsyncpa [#allocation4], 0  ;;  %s1185_s0 = inlined_call_operand.vmem [shape: f32[15], index: 0, kind: input, shape index: {}]   ;;  %s1186_s1 = inlined_call_operand.vmem [shape: f32[16,128], index: 1, kind: input, shape index: {}]   ;;  %s1187_s2 = inlined_call_operand.vmem [shape: f32[32,48], index: 2, kind: input, shape index: {}]   ;;  %s1188_s3 = inlined_call_operand.vmem [shape: f32[32,1], index: 3, kind: input, shape index: {}]   ;;  %s1189_s4 = inlined_call_operand.vmem [shape: f32[32,1], index: 4, kind: input, shape index: {}]   ;;  %s1190_s5 = inlined_call_operand.vmem [shape: f32[32,1], index: 5, kind: input, shape index: {}]   ;;  %s1191_s6 = inlined_call_operand.vmem [shape: f32[32,96], index: 6, kind: input, shape index: {}]   ;;  %s1192_s7 = inlined_call_operand.vmem [shape: f32[32,1], index: 7, kind: input, shape index: {}]   ;;  %s1193_s8 = inlined_call_operand.vmem [shape: f32[32,1], index: 8, kind: input, shape index: {}]   ;;  %s1194_s9 = inlined_call_operand.vmem [shape: f32[32,1], index: 9, kind: input, shape index: {}]   ;;  %s1195_s10 = inlined_call_operand.vmem [shape: f32[8,96], index: 10, kind: input, shape index: {}]   ;;  %s1196_s11 = inlined_call_operand.vmem [shape: f32[8,1], index: 11, kind: input, shape index: {}]   ;;  %s1197_s12 = inlined_call_operand.hbm [shape: f32[8,128], index: 12, kind: output, shape index: {}]  }
   0x1   :  { %18 = vsyncpa [#allocation3], 0  ;;  %s24_s23 = sshll.u32 %s1185_s0, 4  ;;  %s882_s24 = smov [#allocation2]   ;;  %s25_s23 = int_to_ptr.vmem [resolvable:$true] %s24_s23 }
   0x2   :  { %27 = dma.vmem_to_smem %s25_s23, 16, %s882_s24, [#allocation4]  }
   0x3   :  { %878 = dma.done.wait [#allocation4], 16  }
   0x4   :  { %879 = vsyncadd [#allocation4], 4294967280 }
   0x5   :  { %54 = sfence }
   0x6   :  { %v125_v0 = vld [vmem:[%s1188_s3] sm:$0xff]  ;;  %v127_v1 = vld [vmem:[%s1188_s3 + $0x10] sm:$0xff]  ;;  %v883_v2 = vmov 0   ;;  %v56_v3 = vld [vmem:[%s1186_s1 + $0x8] sm:$0xff]  ;;  %s977_s21 = sld [smem:[#allocation2]]  ;;  %vm149_vm8 = vcmask 392192  }
   0x7   :  { %795 = vset.pattern.permute.xlu0 %v883_v2  ;;  %796 = vset.pattern.permute.xlu1 %v883_v2  ;;  %v55_v4 = vld [vmem:[%s1186_s1] sm:$0xff]  ;;  %v748_v5 = vmul.f32 -1.442695, %v56_v3  ;;  %v126_v7 = vld [vmem:[%s1188_s3 + $0x8] sm:$0xff]  ;;  %v128_v8 = vld [vmem:[%s1188_s3 + $0x18] sm:$0xff]  ;;  %s979_s3 = sld [smem:[#allocation2 + $0x1]] }
   0x8   :  { %131 = vperm.xlu0 %795, %v125_v0   ;;  %141 = vperm.xlu1 %796, %v127_v1   ;;  %v747_v6 = vmul.f32 -1.442695, %v55_v4  ;;  %v267_v13 = vld [vmem:[%s1190_s5 + $0x18] sm:$0xff]  ;;  %v237_v14 = vld [vmem:[%s1189_s4 + $0x8] sm:$0xff]  ;;  %s981_s22 = sld [smem:[#allocation2 + $0x2]]  ;;  %v236_v20 = vld [vmem:[%s1189_s4] sm:$0xff] }
   0x9   :  { %797 = vset.pattern.permute.xlu2 %v883_v2  ;;  %798 = vpow2.f32 %v748_v5  ;;  %s983_s23 = sld [smem:[#allocation2 + $0x3]]  ;;  %v265_v24 = vld [vmem:[%s1190_s5 + $0x8] sm:$0xff]  ;;  %v414_v41 = vld [vmem:[%s1192_s7] sm:$0xff]  ;;  %v417_v59 = vld [vmem:[%s1192_s7 + $0x18] sm:$0xff]  ;;  %s884_s20 = smov [#allocation5]  }
   0xa   :  { %800 = vpow2.f32 %v747_v6  ;;  %s991_s28 = sld [smem:[#allocation2 + $0x4]]  ;;  %v415_v43 = vld [vmem:[%s1192_s7 + $0x8] sm:$0xff]  ;;  %v528_v60 = vld [vmem:[%s1193_s8 + $0x18] sm:$0xff]  ;;  %v121_v1 = vld [vmem:[%s1187_s2] sm:$0xff] }
   0xb   :  { %v239_v62 = vld [vmem:[%s1189_s4 + $0x18] sm:$0xff]  ;;  %v526_v0 = vld [vmem:[%s1193_s8 + $0x8] sm:$0xff]  ;;  %v238_v2 = vld [vmem:[%s1189_s4 + $0x10] sm:$0xff]  ;;  %s1087_s26 = sld [smem:[#allocation2 + $0x9]] }
   0xc   :  { %v96_v32 = vstv %s977_s21  ;;  %257 = vperm.xlu2 %797, %v239_v62   ;;  %v556_v63 = vld [vmem:[%s1194_s9 + $0x18] sm:$0xff]  ;;  %v525_v3 = vld [vmem:[%s1193_s8] sm:$0xff]  ;;  %v554_v4 = vld [vmem:[%s1194_s9 + $0x8] sm:$0xff]  ;;  %s775_s15 = sld [smem:[#allocation2 + $0xb]]  ;;  %s735_s21 = sshll.u32 %s884_s20, 4  ;;  %s736_s21 = int_to_ptr.vmem [resolvable:$true] %s735_s21 }
   0xd   :  { %v101_v33 = vstv %s979_s3  ;;  %v122_v5 = vld [vmem:[%s1187_s2 + $0x8] sm:$0xff]  ;;  %v266_v6 = vld [vmem:[%s1190_s5 + $0x10] sm:$0xff]  ;;  %s1141_s16 = sld [smem:[#allocation2 + $0xc]] }
   0xe   :  { %v106_v44 = vstv %s981_s22  ;;  %s1151_s17 = sld [smem:[#allocation2 + $0xd]]  ;;  %s737_s22 = sshll.u32 %s1197_s12, 4  ;;  %s738_s22 = int_to_ptr.hbm [resolvable:$true] %s737_s22 }
   0xf   :  { %v799_v9 = vpop.eup %798  ;;  %v111_v37 = vstv %s983_s23  ;;  %s1154_s1 = sld [smem:[#allocation2 + $0xe]] }
  0x10   :  { %136 = vperm.xlu0 %795, %v126_v7   ;;  %146 = vperm.xlu1 %796, %v128_v8   ;;  %v801_v10 = vpop.eup %800  ;;  %v64_v11 = vadd.f32 1.0, %v799_v9  ;;  %v116_v45 = vstv %s991_s28  ;;  %v700_v7 = vld [vmem:[%s1196_s11] sm:$0xff]  ;;  %v123_v8 = vld [vmem:[%s1187_s2 + $0x10] sm:$0xff] }
  0x11   :  { %v63_v12 = vadd.f32 1.0, %v801_v10  ;;  %v264_v9 = vld [vmem:[%s1190_s5] sm:$0xff]  ;;  %v124_v10 = vld [vmem:[%s1187_s2 + $0x18] sm:$0xff]  ;;  %s761_s2 = sld [smem:[#allocation2 + $0x5]] }
  0x12   :  { %802 = vrcp.f32 %v64_v11  ;;  %vm85_vm0 = vweird.f32 %v64_v11  ;;  %v91_v18 = vand.u32 2147483648, %v64_v11  ;;  %v89_v22 = vand.u32 2147483647, %v64_v11 }
  0x13   :  { %804 = vrcp.f32 %v63_v12  ;;  %v76_v23 = vand.u32 2147483648, %v63_v12  ;;  %vm70_vm2 = vweird.f32 %v63_v12  ;;  %v74_v26 = vand.u32 2147483647, %v63_v12 }
  0x14   :  { %v92_v28 = vor.u32 1.1754944e-38, %v91_v18  ;;  %vm90_vm5 = vcmp.eq.f32.partialorder %v89_v22, 8.507059e+37  ;;  %252 = vperm.xlu2 %797, %v238_v2  }
  0x15   :  { %v77_v31 = vor.u32 1.1754944e-38, %v76_v23  ;;  %vm75_vm7 = vcmp.eq.f32.partialorder %v74_v26, 8.507059e+37 }
  0x18   :  { %285 = vperm.xlu0 %795, %v267_v13   ;;  %247 = vperm.xlu1 %796, %v237_v14   ;;  %v803_v15 = vpop.eup %802  ;;  %v555_v13 = vld [vmem:[%s1194_s9 + $0x10] sm:$0xff]  ;;  %v553_v14 = vld [vmem:[%s1194_s9] sm:$0xff]  ;;  %s1084_s9 = sld [smem:[#allocation2 + $0x8]] }
  0x19   :  { %v805_v16 = vpop.eup %804  ;;  %v81_v17 = vmul.f32 %v803_v15, %v64_v11  ;;  %vm86_vm1 = vweird.f32 %v803_v15  ;;  %v416_v11 = vld [vmem:[%s1192_s7 + $0x10] sm:$0xff]  ;;  %s762_s7 = sld [smem:[#allocation2 + $0x6]] }
  0x1a   :  { %v66_v19 = vmul.f32 %v805_v16, %v63_v12  ;;  %vm71_vm3 = vweird.f32 %v805_v16  ;;  %vm87_vm4 = vmor %vm85_vm0, %vm86_vm1  ;;  %v527_v12 = vld [vmem:[%s1193_s8 + $0x10] sm:$0xff]  ;;  %s1074_s8 = sld [smem:[#allocation2 + $0x7]] }
  0x1b   :  { %v82_v21 = vsub.f32 1.0, %v81_v17  ;;  %vm72_vm6 = vmor %vm70_vm2, %vm71_vm3 }
  0x1c   :  { %v67_v25 = vsub.f32 1.0, %v66_v19  ;;  %280 = vperm.xlu2 %797, %v266_v6  }
  0x1d   :  { %v83_v27 = vmul.f32 %v803_v15, %v82_v21 }
  0x1e   :  { %v68_v29 = vmul.f32 %v805_v16, %v67_v25 }
  0x1f   :  { %v84_v30 = vadd.f32 %v803_v15, %v83_v27 }
  0x20   :  { %242 = vperm.xlu0 %795, %v236_v20   ;;  %275 = vperm.xlu1 %796, %v265_v24   ;;  %v69_v34 = vadd.f32 %v805_v16, %v68_v29 }
  0x21   :  { %v88_v35 = vsel %vm87_vm4, %v803_v15, %v84_v30 }
  0x22   :  { %v93_v36 = vsel %vm90_vm5, %v92_v28, %v88_v35  ;;  %v73_v38 = vsel %vm72_vm6, %v805_v16, %v69_v34 }
  0x23   :  { %v98_v39 = vmul.f32 %v96_v32, %v93_v36  ;;  %v103_v40 = vmul.f32 %v101_v33, %v93_v36  ;;  %v78_v42 = vsel %vm75_vm7, %v77_v31, %v73_v38  ;;  %v113_v49 = vmul.f32 %v111_v37, %v93_v36 }
  0x24   :  { %v97_v46 = vmul.f32 %v96_v32, %v78_v42  ;;  %v102_v47 = vmul.f32 %v101_v33, %v78_v42  ;;  %v112_v51 = vmul.f32 %v111_v37, %v78_v42  ;;  %270 = vperm.xlu2 %797, %v264_v9  }
  0x25   :  { %v105_v48 = vmul.f32 %v103_v40, %v98_v39  ;;  %v118_v53 = vmul.f32 %v116_v45, %v98_v39 }
  0x26   :  { %v104_v50 = vmul.f32 %v102_v47, %v97_v46  ;;  %v117_v55 = vmul.f32 %v116_v45, %v97_v46 }
  0x27   :  { %v108_v52 = vsub.f32 %v105_v48, %v106_v44 }
  0x28   :  { %420 = vperm.xlu0 %795, %v414_v41   ;;  %425 = vperm.xlu1 %796, %v415_v43   ;;  %v107_v54 = vsub.f32 %v104_v50, %v106_v44 }
  0x29   :  { %v115_v56 = vmul.f32 %v113_v49, %v108_v52 }
  0x2a   :  { %v114_v57 = vmul.f32 %v112_v51, %v107_v54 }
  0x2b   :  { %v120_v58 = vsub.f32 %v115_v56, %v118_v53 }
  0x2c   :  { %v119_v61 = vsub.f32 %v114_v57, %v117_v55  ;;  %430 = vperm.xlu2 %797, %v416_v11  }
  0x2d   :  { %172 = vmatpush.msra.mxu0 %v120_v58 }
  0x2f   :  { %173 = vmatpush.msra.mxu0 %v119_v61 }
  0x30   :  { %435 = vperm.xlu0 %795, %v417_v59   ;;  %546 = vperm.xlu1 %796, %v528_v60  }
  0x31   :  { %174 = vmatpush.msra.mxu0 %v108_v52 }
  0x33   :  { %175 = vmatpush.msra.mxu0 %v107_v54 }
  0x34   :  { %541 = vperm.xlu2 %797, %v527_v12  }
  0x35   :  { %176 = vmatpush.msra.mxu0 %v98_v39 }
  0x37   :  { %177 = vmatpush.msra.mxu0 %v97_v46 }
  0x38   :  { %574 = vperm.xlu0 %795, %v556_v63   ;;  %536 = vperm.xlu1 %796, %v526_v0  }
  0x39   :  { %753 = vmatmul.msk.f32.vlgmr.msra.gmra.mxu0 %vm149_vm8, %v121_v1 }
  0x3c   :  { %569 = vperm.xlu2 %797, %v555_v13  }
  0x40   :  { %531 = vperm.xlu0 %795, %v525_v3   ;;  %564 = vperm.xlu1 %796, %v554_v4  }
  0x41   :  { %754 = vmatmul.msk.f32.gmra.mxu0 %vm149_vm8, %v122_v5 }
  0x44   :  { %559 = vperm.xlu2 %797, %v553_v14  }
  0x48   :  { %703 = vperm.xlu0 %795, %v700_v7  }
  0x49   :  { %755 = vmatmul.msk.f32.gmra.mxu0 %vm149_vm8, %v123_v8 }
  0x51   :  { %756 = vmatmul.msk.f32.gmra.mxu0 %vm149_vm8, %v124_v10 }
  0x66   :  { %v258_v48 = vpop.permute.xlu2 %257 }
  0x6e   :  { %v253_v55 = vpop.permute.xlu2 %252 }
  0x76   :  { %v281_v61 = vpop.permute.xlu2 %280 }
  0x7a   :  { %v132_v16 = vpop.permute.xlu0 %131  ;;  %v142_v18 = vpop.permute.xlu1 %141 }
  0x82   :  { %v137_v19 = vpop.permute.xlu0 %136  ;;  %v147_v28 = vpop.permute.xlu1 %146 }
  0x8a   :  { %v286_v58 = vpop.permute.xlu0 %285  ;;  %v248_v60 = vpop.permute.xlu1 %247 }
  0x92   :  { %v243_v10 = vpop.permute.xlu0 %242 }
  0xb6   :  { %v179_v15 = vpop.f32.mrf.mxu0 }
  0xb7   :  { %v180_v22 = vadd.f32 %v179_v15, %v132_v16  ;;  %v276_v15 = vpop.permute.xlu1 %275  ;;  %v271_v16 = vpop.permute.xlu2 %270 }
  0xb9   :  { %v201_v25 = vmul.f32 %v180_v22, %v180_v22 }
  0xbe   :  { %v182_v17 = vpop.f32.mrf.mxu0 }
  0xbf   :  { %v183_v21 = vadd.f32 %v182_v17, %v137_v19 }
  0xc1   :  { %v202_v24 = vmul.f32 %v183_v21, %v183_v21  ;;  %v191_v26 = vadd.f32 %v183_v21, %v180_v22 }
  0xc3   :  { %v205_v30 = vadd.f32 %v202_v24, %v201_v25 }
  0xc6   :  { %v185_v20 = vpop.f32.mrf.mxu0 }
  0xc7   :  { %v186_v23 = vadd.f32 %v185_v20, %v142_v18 }
  0xc9   :  { %v203_v27 = vmul.f32 %v186_v23, %v186_v23  ;;  %v192_v31 = vadd.f32 %v191_v26, %v186_v23 }
  0xcb   :  { %v206_v33 = vadd.f32 %v205_v30, %v203_v27 }
  0xce   :  { %v188_v29 = vpop.f32.mrf.mxu0 }
  0xcf   :  { %v189_v32 = vadd.f32 %v188_v29, %v147_v28 }
  0xd1   :  { %v193_v34 = vadd.f32 %v192_v31, %v189_v32  ;;  %v204_v35 = vmul.f32 %v189_v32, %v189_v32 }
  0xd3   :  { %v194_v36 = vrot.slane %v193_v34, 4  ;;  %v207_v37 = vadd.f32 %v206_v33, %v204_v35  ;;  %v1066_v35 = vstv %s761_s2 }
  0xd5   :  { %v195_v38 = vadd.f32 %v194_v36, %v193_v34  ;;  %v208_v39 = vrot.slane %v207_v37, 4  ;;  %v1068_v36 = vstv %s762_s7 }
  0xd7   :  { %v196_v40 = vrot.slane %v195_v38, 2  ;;  %v209_v41 = vadd.f32 %v208_v39, %v207_v37 }
  0xd9   :  { %v197_v42 = vadd.f32 %v196_v40, %v195_v38  ;;  %v210_v43 = vrot.slane %v209_v41, 2 }
  0xdb   :  { %v198_v44 = vrot.slane %v197_v42, 1  ;;  %v211_v45 = vadd.f32 %v210_v43, %v209_v41 }
  0xdd   :  { %v199_v46 = vadd.f32 %v198_v44, %v197_v42  ;;  %v212_v47 = vrot.slane %v211_v45, 1 }
  0xdf   :  { %v200_v49 = vmul.f32 0.03125, %v199_v46  ;;  %v213_v50 = vadd.f32 %v212_v47, %v211_v45 }
  0xe1   :  { %v214_v51 = vmul.f32 0.03125, %v213_v50  ;;  %v215_v52 = vmul.f32 %v200_v49, %v200_v49  ;;  %v217_v1 = vsub.f32 %v180_v22, %v200_v49  ;;  %v218_v2 = vsub.f32 %v183_v21, %v200_v49 }
  0xe2   :  { %v219_v3 = vsub.f32 %v186_v23, %v200_v49  ;;  %v220_v4 = vsub.f32 %v189_v32, %v200_v49 }
  0xe3   :  { %v216_v53 = vsub.f32 %v214_v51, %v215_v52 }
  0xe5   :  { %v221_v54 = vadd.f32 1e-05, %v216_v53 }
  0xe7   :  { %806 = vrsqrt.f32 %v221_v54  ;;  %vm228_vm10 = vweird.f32 %v221_v54 }
  0xed   :  { %v807_v56 = vpop.eup %806 }
  0xee   :  { %v223_v57 = vmul.f32 %v807_v56, %v221_v54  ;;  %vm229_vm9 = vweird.f32 %v807_v56 }
  0xef   :  { %vm230_vm11 = vmor %vm228_vm10, %vm229_vm9 }
  0xf0   :  { %v224_v59 = vmul.f32 %v807_v56, %v223_v57 }
  0xf2   :  { %v225_v62 = vmul.f32 0.5, %v224_v59 }
  0xf4   :  { %v226_v63 = vsub.f32 1.5, %v225_v62 }
  0xf6   :  { %v227_v0 = vmul.f32 %v807_v56, %v226_v63 }
  0xf8   :  { %v231_v5 = vsel %vm230_vm11, %v807_v56, %v227_v0 }
  0xf9   :  { %v232_v6 = vmul.f32 %v231_v5, %v217_v1  ;;  %v233_v7 = vmul.f32 %v231_v5, %v218_v2  ;;  %v234_v8 = vmul.f32 %v231_v5, %v219_v3  ;;  %v235_v9 = vmul.f32 %v231_v5, %v220_v4 }
  0xfb   :  { %v260_v11 = vmul.f32 %v243_v10, %v232_v6  ;;  %v261_v12 = vmul.f32 %v248_v60, %v233_v7  ;;  %v262_v13 = vmul.f32 %v253_v55, %v234_v8  ;;  %v263_v14 = vmul.f32 %v258_v48, %v235_v9  ;;  %v431_v60 = vpop.permute.xlu2 %430 }
  0xfd   :  { %v288_v17 = vadd.f32 %v271_v16, %v260_v11  ;;  %v289_v18 = vadd.f32 %v276_v15, %v261_v12  ;;  %v290_v19 = vadd.f32 %v281_v61, %v262_v13  ;;  %v291_v20 = vadd.f32 %v286_v58, %v263_v14 }
  0xff   :  { %v757_v21 = vmul.f32 -1.442695, %v288_v17  ;;  %v758_v22 = vmul.f32 -1.442695, %v289_v18  ;;  %v759_v23 = vmul.f32 -1.442695, %v290_v19 }
 0x100   :  { %v760_v24 = vmul.f32 -1.442695, %v291_v20 }
 0x101   :  { %808 = vpow2.f32 %v757_v21 }
 0x102   :  { %810 = vpow2.f32 %v758_v22  ;;  %v385_v22 = vstv %s1074_s8 }
 0x103   :  { %812 = vpow2.f32 %v759_v23 }
 0x104   :  { %814 = vpow2.f32 %v760_v24  ;;  %v392_v24 = vstv %s1084_s9 }
 0x107   :  { %v809_v25 = vpop.eup %808 }
 0x108   :  { %v811_v26 = vpop.eup %810  ;;  %v304_v27 = vadd.f32 1.0, %v809_v25 }
 0x109   :  { %v813_v28 = vpop.eup %812  ;;  %v305_v29 = vadd.f32 1.0, %v811_v26 }
 0x10a   :  { %v815_v30 = vpop.eup %814  ;;  %v306_v31 = vadd.f32 1.0, %v813_v28  ;;  %816 = vrcp.f32 %v304_v27  ;;  %vm313_vm12 = vweird.f32 %v304_v27  ;;  %v317_v41 = vand.u32 2147483647, %v304_v27 }
 0x10b   :  { %v307_v32 = vadd.f32 1.0, %v815_v30  ;;  %818 = vrcp.f32 %v305_v29  ;;  %vm328_vm13 = vweird.f32 %v305_v29  ;;  %v332_v39 = vand.u32 2147483647, %v305_v29 }
 0x10c   :  { %820 = vrcp.f32 %v306_v31  ;;  %v347_v33 = vand.u32 2147483647, %v306_v31  ;;  %v349_v37 = vand.u32 2147483648, %v306_v31  ;;  %vm343_vm15 = vweird.f32 %v306_v31 }
 0x10d   :  { %822 = vrcp.f32 %v307_v32  ;;  %vm358_vm14 = vweird.f32 %v307_v32  ;;  %v362_v43 = vand.u32 2147483647, %v307_v32  ;;  %v364_v46 = vand.u32 2147483648, %v307_v32 }
 0x10e   :  { %vm1070_vm0 = vcmp.eq.f32.partialorder %v347_v33, 8.507059e+37  ;;  %v350_v51 = vor.u32 1.1754944e-38, %v349_v37  ;;  %v319_v53 = vand.u32 2147483648, %v304_v27  ;;  %v334_v55 = vand.u32 2147483648, %v305_v29 }
 0x10f   :  { %vm1076_vm3 = vcmp.eq.f32.partialorder %v332_v39, 8.507059e+37  ;;  %vm1080_vm4 = vcmp.eq.f32.partialorder %v362_v43, 8.507059e+37  ;;  %vm318_vm9 = vcmp.eq.f32.partialorder %v317_v41, 8.507059e+37  ;;  %v365_v6 = vor.u32 1.1754944e-38, %v364_v46 }
 0x110   :  { %v817_v34 = vpop.eup %816  ;;  %v320_v1 = vor.u32 1.1754944e-38, %v319_v53  ;;  %v335_v3 = vor.u32 1.1754944e-38, %v334_v55  ;;  %v401_v28 = vstv %s1087_s26 }
 0x111   :  { %v819_v38 = vpop.eup %818  ;;  %v309_v40 = vmul.f32 %v817_v34, %v304_v27  ;;  %vm314_vm1 = vweird.f32 %v817_v34 }
 0x112   :  { %v821_v42 = vpop.eup %820  ;;  %v324_v44 = vmul.f32 %v819_v38, %v305_v29  ;;  %vm329_vm2 = vweird.f32 %v819_v38  ;;  %vm315_vm7 = vmor %vm313_vm12, %vm314_vm1  ;;  %vm438_vm12 = vcmask 785408  }
 0x113   :  { %v823_v45 = vpop.eup %822  ;;  %v339_v47 = vmul.f32 %v821_v42, %v306_v31  ;;  %v310_v49 = vsub.f32 1.0, %v309_v40  ;;  %vm344_vm5 = vweird.f32 %v821_v42  ;;  %vm330_vm8 = vmor %vm328_vm13, %vm329_vm2 }
 0x114   :  { %v354_v50 = vmul.f32 %v823_v45, %v307_v32  ;;  %v325_v52 = vsub.f32 1.0, %v324_v44  ;;  %vm359_vm6 = vweird.f32 %v823_v45  ;;  %vm345_vm10 = vmor %vm343_vm15, %vm344_vm5 }
 0x115   :  { %v340_v54 = vsub.f32 1.0, %v339_v47  ;;  %v311_v56 = vmul.f32 %v817_v34, %v310_v49  ;;  %vm360_vm11 = vmor %vm358_vm14, %vm359_vm6  ;;  %v410_v49 = vld [vmem:[%s1191_s6] sm:$0xff] }
 0x116   :  { %v355_v57 = vsub.f32 1.0, %v354_v50  ;;  %v326_v58 = vmul.f32 %v819_v38, %v325_v52  ;;  %v412_v50 = vld [vmem:[%s1191_s6 + $0x10] sm:$0xff]  ;;  %v413_v52 = vld [vmem:[%s1191_s6 + $0x18] sm:$0xff] }
 0x117   :  { %v341_v61 = vmul.f32 %v821_v42, %v340_v54  ;;  %v312_v62 = vadd.f32 %v817_v34, %v311_v56  ;;  %v421_v54 = vpop.permute.xlu0 %420 }
 0x118   :  { %v356_v63 = vmul.f32 %v823_v45, %v355_v57  ;;  %v327_v0 = vadd.f32 %v819_v38, %v326_v58  ;;  %v426_v57 = vpop.permute.xlu1 %425 }
 0x119   :  { %v342_v2 = vadd.f32 %v821_v42, %v341_v61  ;;  %v316_v4 = vsel %vm315_vm7, %v817_v34, %v312_v62 }
 0x11a   :  { %v357_v5 = vadd.f32 %v823_v45, %v356_v63  ;;  %v331_v7 = vsel %vm330_vm8, %v819_v38, %v327_v0  ;;  %v321_v8 = vsel %vm318_vm9, %v320_v1, %v316_v4 }
 0x11b   :  { %v346_v9 = vsel %vm345_vm10, %v821_v42, %v342_v2  ;;  %v336_v10 = vsel %vm1076_vm3, %v335_v3, %v331_v7  ;;  %v1097_v11 = vmul.f32 %v1066_v35, %v321_v8  ;;  %v377_v12 = vmul.f32 %v1068_v36, %v321_v8 }
 0x11c   :  { %v361_v13 = vsel %vm360_vm11, %v823_v45, %v357_v5  ;;  %v351_v14 = vsel %vm1070_vm0, %v350_v51, %v346_v9  ;;  %v371_v15 = vmul.f32 %v1066_v35, %v336_v10  ;;  %v378_v16 = vmul.f32 %v1068_v36, %v336_v10  ;;  %v411_v51 = vld [vmem:[%s1191_s6 + $0x8] sm:$0xff]  ;;  %s774_s6 = sld [smem:[#allocation2 + $0xa]] }
 0x11d   :  { %v366_v17 = vsel %vm1080_vm4, %v365_v6, %v361_v13  ;;  %v372_v18 = vmul.f32 %v1066_v35, %v351_v14  ;;  %v379_v19 = vmul.f32 %v1068_v36, %v351_v14  ;;  %v381_v27 = vmul.f32 %v377_v12, %v1097_v11 }
 0x11e   :  { %v373_v20 = vmul.f32 %v1066_v35, %v366_v17  ;;  %v380_v21 = vmul.f32 %v1068_v36, %v366_v17  ;;  %v382_v23 = vmul.f32 %v378_v16, %v371_v15  ;;  %v396_v31 = vmul.f32 %v392_v24, %v366_v17 }
 0x11f   :  { %v383_v25 = vmul.f32 %v379_v19, %v372_v18  ;;  %v395_v32 = vmul.f32 %v392_v24, %v351_v14  ;;  %v394_v34 = vmul.f32 %v392_v24, %v336_v10  ;;  %v386_v35 = vsub.f32 %v381_v27, %v385_v22  ;;  %v436_v2 = vpop.permute.xlu0 %435 }
 0x120   :  { %v384_v26 = vmul.f32 %v380_v21, %v373_v20  ;;  %v387_v33 = vsub.f32 %v382_v23, %v385_v22  ;;  %v405_v38 = vmul.f32 %v401_v28, %v373_v20  ;;  %v404_v36 = vmul.f32 %v401_v28, %v372_v18 }
 0x121   :  { %v388_v29 = vsub.f32 %v383_v25, %v385_v22  ;;  %v393_v42 = vmul.f32 %v392_v24, %v321_v8  ;;  %v403_v44 = vmul.f32 %v401_v28, %v371_v15  ;;  %v402_v47 = vmul.f32 %v401_v28, %v1097_v11  ;;  %v547_v28 = vpop.permute.xlu1 %546 }
 0x122   :  { %v389_v30 = vsub.f32 %v384_v26, %v385_v22  ;;  %v398_v41 = vmul.f32 %v394_v34, %v387_v33 }
 0x123   :  { %v399_v39 = vmul.f32 %v395_v32, %v388_v29  ;;  %v397_v45 = vmul.f32 %v393_v42, %v386_v35 }
 0x124   :  { %v400_v37 = vmul.f32 %v396_v31, %v389_v30  ;;  %v407_v46 = vsub.f32 %v398_v41, %v403_v44 }
 0x125   :  { %v408_v43 = vsub.f32 %v399_v39, %v404_v36  ;;  %v406_v48 = vsub.f32 %v397_v45, %v402_v47 }
 0x126   :  { %v409_v40 = vsub.f32 %v400_v37, %v405_v38 }
 0x127   :  { %v575_v32 = vpop.permute.xlu0 %574 }
 0x128   :  { %455 = vmatpush.msra.mxu1 %v409_v40  ;;  %780 = vmatpush.msra.mxu3 %v409_v40 }
 0x129   :  { %v537_v34 = vpop.permute.xlu1 %536 }
 0x12a   :  { %456 = vmatpush.msra.mxu1 %v408_v43  ;;  %781 = vmatpush.msra.mxu3 %v408_v43 }
 0x12c   :  { %457 = vmatpush.msra.mxu1 %v407_v46  ;;  %782 = vmatpush.msra.mxu3 %v407_v46 }
 0x12e   :  { %458 = vmatpush.msra.mxu1 %v406_v48  ;;  %783 = vmatpush.msra.mxu3 %v406_v48 }
 0x12f   :  { %v532_v48 = vpop.permute.xlu0 %531 }
 0x130   :  { %459 = vmatpush.msra.mxu1 %v389_v30  ;;  %784 = vmatpush.msra.mxu3 %v389_v30 }
 0x132   :  { %460 = vmatpush.msra.mxu1 %v388_v29  ;;  %785 = vmatpush.msra.mxu3 %v388_v29  ;;  %v542_v29 = vpop.permute.xlu2 %541 }
 0x134   :  { %461 = vmatpush.msra.mxu1 %v387_v33  ;;  %786 = vmatpush.msra.mxu3 %v387_v33 }
 0x136   :  { %462 = vmatpush.msra.mxu1 %v386_v35  ;;  %787 = vmatpush.msra.mxu3 %v386_v35 }
 0x138   :  { %463 = vmatpush.msra.mxu1 %v373_v20  ;;  %788 = vmatpush.msra.mxu3 %v373_v20 }
 0x13a   :  { %464 = vmatpush.msra.mxu1 %v372_v18  ;;  %789 = vmatpush.msra.mxu3 %v372_v18  ;;  %v570_v37 = vpop.permute.xlu2 %569 }
 0x13c   :  { %465 = vmatpush.msra.mxu1 %v371_v15  ;;  %790 = vmatpush.msra.mxu3 %v371_v15 }
 0x13e   :  { %466 = vmatpush.msra.mxu1 %v1097_v11  ;;  %791 = vmatpush.msra.mxu3 %v1097_v11 }
 0x13f   :  { %766 = vmatmul.msk.f32.vlgmr.msra.gmra.mxu1 %vm438_vm12, %v410_v49  ;;  %768 = vmatmul.msk.f32.vlgmr.msra.gmra.mxu3 %vm438_vm12, %v412_v50 }
 0x147   :  { %767 = vmatmul.msk.f32.gmra.mxu1 %vm438_vm12, %v411_v51  ;;  %769 = vmatmul.msk.f32.gmra.mxu3 %vm438_vm12, %v413_v52 }
 0x1bc   :  { %v468_v53 = vpop.f32.mrf.mxu1 }
 0x1bd   :  { %v469_v56 = vadd.f32 %v468_v53, %v421_v54  ;;  %v565_v53 = vpop.permute.xlu1 %564  ;;  %v560_v54 = vpop.permute.xlu2 %559 }
 0x1bf   :  { %v490_v61 = vmul.f32 %v469_v56, %v469_v56 }
 0x1c2   :  { %v474_v55 = vpop.f32.mrf.mxu3 }
 0x1c3   :  { %v475_v62 = vadd.f32 %v474_v55, %v431_v60 }
 0x1c4   :  { %v471_v58 = vpop.f32.mrf.mxu1 }
 0x1c5   :  { %v472_v59 = vadd.f32 %v471_v58, %v426_v57  ;;  %v492_v4 = vmul.f32 %v475_v62, %v475_v62 }
 0x1c7   :  { %v480_v63 = vadd.f32 %v472_v59, %v469_v56  ;;  %v491_v0 = vmul.f32 %v472_v59, %v472_v59 }
 0x1c9   :  { %v494_v1 = vadd.f32 %v491_v0, %v490_v61  ;;  %v481_v6 = vadd.f32 %v480_v63, %v475_v62 }
 0x1ca   :  { %v477_v3 = vpop.f32.mrf.mxu3 }
 0x1cb   :  { %v478_v5 = vadd.f32 %v477_v3, %v436_v2  ;;  %v495_v9 = vadd.f32 %v494_v1, %v492_v4 }
 0x1cd   :  { %v482_v7 = vadd.f32 %v481_v6, %v478_v5  ;;  %v493_v8 = vmul.f32 %v478_v5, %v478_v5 }
 0x1cf   :  { %v483_v10 = vrot.slane %v482_v7, 4  ;;  %v496_v11 = vadd.f32 %v495_v9, %v493_v8  ;;  %v1133_v9 = vstv %s774_s6 }
 0x1d1   :  { %v484_v12 = vadd.f32 %v483_v10, %v482_v7  ;;  %v497_v13 = vrot.slane %v496_v11, 4  ;;  %v1135_v10 = vstv %s775_s15 }
 0x1d3   :  { %v485_v14 = vrot.slane %v484_v12, 2  ;;  %v498_v15 = vadd.f32 %v497_v13, %v496_v11 }
 0x1d5   :  { %v486_v16 = vadd.f32 %v485_v14, %v484_v12  ;;  %v499_v17 = vrot.slane %v498_v15, 2 }
 0x1d7   :  { %v487_v18 = vrot.slane %v486_v16, 1  ;;  %v500_v19 = vadd.f32 %v499_v17, %v498_v15 }
 0x1d9   :  { %v488_v20 = vadd.f32 %v487_v18, %v486_v16  ;;  %v501_v21 = vrot.slane %v500_v19, 1 }
 0x1db   :  { %v489_v22 = vmul.f32 0.03125, %v488_v20  ;;  %v502_v23 = vadd.f32 %v501_v21, %v500_v19 }
 0x1dd   :  { %v503_v24 = vmul.f32 0.03125, %v502_v23  ;;  %v504_v25 = vmul.f32 %v489_v22, %v489_v22  ;;  %v506_v40 = vsub.f32 %v469_v56, %v489_v22  ;;  %v507_v36 = vsub.f32 %v472_v59, %v489_v22 }
 0x1de   :  { %v508_v41 = vsub.f32 %v475_v62, %v489_v22  ;;  %v509_v42 = vsub.f32 %v478_v5, %v489_v22 }
 0x1df   :  { %v505_v26 = vsub.f32 %v503_v24, %v504_v25 }
 0x1e1   :  { %v510_v27 = vadd.f32 1e-05, %v505_v26 }
 0x1e3   :  { %824 = vrsqrt.f32 %v510_v27  ;;  %vm517_vm14 = vweird.f32 %v510_v27 }
 0x1e9   :  { %v825_v30 = vpop.eup %824 }
 0x1ea   :  { %v512_v31 = vmul.f32 %v825_v30, %v510_v27  ;;  %vm518_vm13 = vweird.f32 %v825_v30 }
 0x1eb   :  { %vm519_vm15 = vmor %vm517_vm14, %vm518_vm13 }
 0x1ec   :  { %v513_v33 = vmul.f32 %v825_v30, %v512_v31 }
 0x1ee   :  { %v514_v38 = vmul.f32 0.5, %v513_v33 }
 0x1f0   :  { %v515_v39 = vsub.f32 1.5, %v514_v38 }
 0x1f2   :  { %v516_v35 = vmul.f32 %v825_v30, %v515_v39 }
 0x1f4   :  { %v520_v43 = vsel %vm519_vm15, %v825_v30, %v516_v35 }
 0x1f5   :  { %v521_v44 = vmul.f32 %v520_v43, %v506_v40  ;;  %v522_v45 = vmul.f32 %v520_v43, %v507_v36  ;;  %v523_v46 = vmul.f32 %v520_v43, %v508_v41  ;;  %v524_v47 = vmul.f32 %v520_v43, %v509_v42 }
 0x1f7   :  { %v549_v49 = vmul.f32 %v532_v48, %v521_v44  ;;  %v550_v50 = vmul.f32 %v537_v34, %v522_v45  ;;  %v551_v51 = vmul.f32 %v542_v29, %v523_v46  ;;  %v552_v52 = vmul.f32 %v547_v28, %v524_v47 }
 0x1f9   :  { %v577_v55 = vadd.f32 %v560_v54, %v549_v49  ;;  %v578_v57 = vadd.f32 %v565_v53, %v550_v50  ;;  %v579_v58 = vadd.f32 %v570_v37, %v551_v51  ;;  %v580_v56 = vadd.f32 %v575_v32, %v552_v52 }
 0x1fb   :  { %v770_v59 = vmul.f32 -1.442695, %v577_v55  ;;  %v771_v60 = vmul.f32 -1.442695, %v578_v57  ;;  %v772_v61 = vmul.f32 -1.442695, %v579_v58 }
 0x1fc   :  { %v773_v62 = vmul.f32 -1.442695, %v580_v56 }
 0x1fd   :  { %826 = vpow2.f32 %v770_v59 }
 0x1fe   :  { %828 = vpow2.f32 %v771_v60  ;;  %v674_v60 = vstv %s1141_s16 }
 0x1ff   :  { %830 = vpow2.f32 %v772_v61 }
 0x200   :  { %832 = vpow2.f32 %v773_v62  ;;  %v681_v62 = vstv %s1151_s17 }
 0x203   :  { %v827_v63 = vpop.eup %826 }
 0x204   :  { %v829_v0 = vpop.eup %828  ;;  %v593_v1 = vadd.f32 1.0, %v827_v63 }
 0x205   :  { %v831_v2 = vpop.eup %830  ;;  %v594_v3 = vadd.f32 1.0, %v829_v0 }
 0x206   :  { %v833_v4 = vpop.eup %832  ;;  %v595_v5 = vadd.f32 1.0, %v831_v2  ;;  %834 = vrcp.f32 %v593_v1  ;;  %vm602_vm0 = vweird.f32 %v593_v1  ;;  %v606_v15 = vand.u32 2147483647, %v593_v1 }
 0x207   :  { %v596_v6 = vadd.f32 1.0, %v833_v4  ;;  %836 = vrcp.f32 %v594_v3  ;;  %vm617_vm1 = vweird.f32 %v594_v3  ;;  %v621_v13 = vand.u32 2147483647, %v594_v3 }
 0x208   :  { %838 = vrcp.f32 %v595_v5  ;;  %v636_v7 = vand.u32 2147483647, %v595_v5  ;;  %v638_v11 = vand.u32 2147483648, %v595_v5  ;;  %vm632_vm3 = vweird.f32 %v595_v5 }
 0x209   :  { %840 = vrcp.f32 %v596_v6  ;;  %vm647_vm2 = vweird.f32 %v596_v6  ;;  %v651_v17 = vand.u32 2147483647, %v596_v6  ;;  %v653_v20 = vand.u32 2147483648, %v596_v6 }
 0x20a   :  { %vm1137_vm4 = vcmp.eq.f32.partialorder %v636_v7, 8.507059e+37  ;;  %v639_v25 = vor.u32 1.1754944e-38, %v638_v11  ;;  %v608_v27 = vand.u32 2147483648, %v593_v1  ;;  %v623_v29 = vand.u32 2147483648, %v594_v3 }
 0x20b   :  { %vm1143_vm7 = vcmp.eq.f32.partialorder %v621_v13, 8.507059e+37  ;;  %vm1147_vm8 = vcmp.eq.f32.partialorder %v651_v17, 8.507059e+37  ;;  %vm607_vm14 = vcmp.eq.f32.partialorder %v606_v15, 8.507059e+37  ;;  %v654_v44 = vor.u32 1.1754944e-38, %v653_v20 }
 0x20c   :  { %v835_v8 = vpop.eup %834  ;;  %v609_v40 = vor.u32 1.1754944e-38, %v608_v27  ;;  %v624_v41 = vor.u32 1.1754944e-38, %v623_v29  ;;  %v690_v2 = vstv %s1154_s1 }
 0x20d   :  { %v837_v12 = vpop.eup %836  ;;  %v598_v14 = vmul.f32 %v835_v8, %v593_v1  ;;  %vm603_vm5 = vweird.f32 %v835_v8 }
 0x20e   :  { %v839_v16 = vpop.eup %838  ;;  %v613_v18 = vmul.f32 %v837_v12, %v594_v3  ;;  %vm618_vm6 = vweird.f32 %v837_v12  ;;  %vm604_vm11 = vmor %vm602_vm0, %vm603_vm5 }
 0x20f   :  { %v841_v19 = vpop.eup %840  ;;  %v628_v21 = vmul.f32 %v839_v16, %v595_v5  ;;  %v599_v23 = vsub.f32 1.0, %v598_v14  ;;  %vm633_vm9 = vweird.f32 %v839_v16  ;;  %vm619_vm13 = vmor %vm617_vm1, %vm618_vm6 }
 0x210   :  { %v643_v24 = vmul.f32 %v841_v19, %v596_v6  ;;  %v614_v26 = vsub.f32 1.0, %v613_v18  ;;  %vm648_vm10 = vweird.f32 %v841_v19  ;;  %vm634_vm15 = vmor %vm632_vm3, %vm633_vm9 }
 0x211   :  { %v629_v28 = vsub.f32 1.0, %v628_v21  ;;  %v600_v30 = vmul.f32 %v835_v8, %v599_v23  ;;  %vm649_vm0 = vmor %vm647_vm2, %vm648_vm10  ;;  %v699_v23 = vld [vmem:[%s1195_s10] sm:$0xff] }
 0x212   :  { %v644_v31 = vsub.f32 1.0, %v643_v24  ;;  %v615_v32 = vmul.f32 %v837_v12, %v614_v26  ;;  %v704_v24 = vpop.permute.xlu0 %703 }
 0x213   :  { %v630_v37 = vmul.f32 %v839_v16, %v629_v28  ;;  %v601_v38 = vadd.f32 %v835_v8, %v600_v30 }
 0x214   :  { %v645_v39 = vmul.f32 %v841_v19, %v644_v31  ;;  %v616_v35 = vadd.f32 %v837_v12, %v615_v32 }
 0x215   :  { %v631_v36 = vadd.f32 %v839_v16, %v630_v37  ;;  %v605_v42 = vsel %vm604_vm11, %v835_v8, %v601_v38 }
 0x216   :  { %v646_v43 = vadd.f32 %v841_v19, %v645_v39  ;;  %v620_v45 = vsel %vm619_vm13, %v837_v12, %v616_v35  ;;  %v610_v46 = vsel %vm607_vm14, %v609_v40, %v605_v42 }
 0x217   :  { %v635_v47 = vsel %vm634_vm15, %v839_v16, %v631_v36  ;;  %v625_v48 = vsel %vm1143_vm7, %v624_v41, %v620_v45  ;;  %v659_v49 = vmul.f32 %v1133_v9, %v610_v46  ;;  %v666_v50 = vmul.f32 %v1135_v10, %v610_v46 }
 0x218   :  { %v650_v51 = vsel %vm649_vm0, %v841_v19, %v646_v43  ;;  %v640_v52 = vsel %vm1137_vm4, %v639_v25, %v635_v47  ;;  %v660_v53 = vmul.f32 %v1133_v9, %v625_v48  ;;  %v667_v54 = vmul.f32 %v1135_v10, %v625_v48 }
 0x219   :  { %v655_v55 = vsel %vm1147_vm8, %v654_v44, %v650_v51  ;;  %v661_v57 = vmul.f32 %v1133_v9, %v640_v52  ;;  %v668_v58 = vmul.f32 %v1135_v10, %v640_v52  ;;  %v670_v1 = vmul.f32 %v666_v50, %v659_v49 }
 0x21a   :  { %v662_v56 = vmul.f32 %v1133_v9, %v655_v55  ;;  %v669_v59 = vmul.f32 %v1135_v10, %v655_v55  ;;  %v671_v61 = vmul.f32 %v667_v54, %v660_v53  ;;  %v685_v5 = vmul.f32 %v681_v62, %v655_v55 }
 0x21b   :  { %v672_v63 = vmul.f32 %v668_v58, %v661_v57  ;;  %v684_v6 = vmul.f32 %v681_v62, %v640_v52  ;;  %v683_v8 = vmul.f32 %v681_v62, %v625_v48  ;;  %v675_v14 = vsub.f32 %v670_v1, %v674_v60 }
 0x21c   :  { %v673_v0 = vmul.f32 %v669_v59, %v662_v56  ;;  %v676_v7 = vsub.f32 %v671_v61, %v674_v60  ;;  %v694_v12 = vmul.f32 %v690_v2, %v662_v56  ;;  %v693_v15 = vmul.f32 %v690_v2, %v661_v57 }
 0x21d   :  { %v677_v3 = vsub.f32 %v672_v63, %v674_v60  ;;  %v682_v16 = vmul.f32 %v681_v62, %v610_v46  ;;  %v692_v18 = vmul.f32 %v690_v2, %v660_v53  ;;  %v691_v21 = vmul.f32 %v690_v2, %v659_v49 }
 0x21e   :  { %v678_v4 = vsub.f32 %v673_v0, %v674_v60  ;;  %v687_v10 = vmul.f32 %v683_v8, %v676_v7 }
 0x21f   :  { %v688_v13 = vmul.f32 %v684_v6, %v677_v3  ;;  %v686_v19 = vmul.f32 %v682_v16, %v675_v14 }
 0x220   :  { %v689_v11 = vmul.f32 %v685_v5, %v678_v4  ;;  %v696_v20 = vsub.f32 %v687_v10, %v692_v18 }
 0x221   :  { %v697_v17 = vsub.f32 %v688_v13, %v693_v15  ;;  %v695_v22 = vsub.f32 %v686_v19, %v691_v21 }
 0x222   :  { %v698_v9 = vsub.f32 %v689_v11, %v694_v12 }
 0x224   :  { %713 = vmatpush.msra.mxu2 %v698_v9 }
 0x226   :  { %714 = vmatpush.msra.mxu2 %v697_v17 }
 0x228   :  { %715 = vmatpush.msra.mxu2 %v696_v20 }
 0x22a   :  { %716 = vmatpush.msra.mxu2 %v695_v22 }
 0x22c   :  { %717 = vmatpush.msra.mxu2 %v678_v4 }
 0x22e   :  { %718 = vmatpush.msra.mxu2 %v677_v3 }
 0x230   :  { %719 = vmatpush.msra.mxu2 %v676_v7 }
 0x232   :  { %720 = vmatpush.msra.mxu2 %v675_v14 }
 0x234   :  { %721 = vmatpush.msra.mxu2 %v662_v56 }
 0x236   :  { %722 = vmatpush.msra.mxu2 %v661_v57 }
 0x238   :  { %723 = vmatpush.msra.mxu2 %v660_v53 }
 0x23a   :  { %724 = vmatpush.msra.mxu2 %v659_v49 }
 0x23b   :  { %779 = vmatmul.msk.f32.vlgmr.msra.gmra.mxu2 %vm438_vm12, %v699_v23 }
 0x2be   :  { %v726_v25 = vpop.f32.mrf.mxu2 }
 0x2bf   :  { %v727_v26 = vadd.f32 %v726_v25, %v704_v24 }
 0x2c1   :  { %729 = vst [vmem:[#allocation5] sm:$0xff] %v727_v26 }
 0x2c2   :  { %740 = dma.vmem_to_hbm [thread:$0]  %s736_s21, 128, %s738_s22, [#allocation3]  }
 0x2c3   :  { %880 = dma.done.wait [#allocation3], 128  }
 0x2c4   :  { %881 = vsyncadd [#allocation3], 4294967168 }
 0x2c5   :  { %745 = vsyncpa [#allocation3], 1 }
 0x2c6   :  { %746 = vsyncpa [#allocation4], 1 }

</bundles_post_ra>
